<compile_context>
chip_gen: v7x
topology: tpu7x:2x2x1
jax: 0.10.0
libtpu: 0.0.40
codegen_flags: <defaults>
</compile_context>

<pallas_src>
import functools

import jax
import jax.numpy as jnp
from jax.experimental import pallas as pl
from jax.experimental.pallas import tpu as pltpu

_EPS_PDIST = 1e-6   # nn.PairwiseDistance eps (added to the difference)
_EPS_CERT = 1e-6    # torch.clamp(certainty, 1e-06)
_THRES = 0.05
_LANES = 128
_SUBLANES = 8


def _round_up(x, m):
    return ((x + m - 1) // m) * m


def _loss_kernel(pred_ref, target_ref, mask_ref, cert_ref,
                 loss_acc_ref, mask_acc_ref, cnt_acc_ref):
    t = pl.program_id(1)

    # Output blocks are resident across the spatial ("arbitrary") axis:
    # zero them at the first spatial tile of each batch element.
    @pl.when(t == 0)
    def _():
        loss_acc_ref[...] = jnp.zeros_like(loss_acc_ref)
        mask_acc_ref[...] = jnp.zeros_like(mask_acc_ref)
        cnt_acc_ref[...] = jnp.zeros_like(cnt_acc_ref)

    pred = pred_ref[...].astype(jnp.float32)       # (C, Tr, 128)
    target = target_ref[...].astype(jnp.float32)   # (C, Tr, 128)

    # PairwiseDistance(p=2) over channels: ||pred - target + eps||_2
    diff = pred - target + _EPS_PDIST
    loss_reg = jnp.sqrt(jnp.sum(diff * diff, axis=0))          # (Tr, 128)

    cert = jnp.maximum(cert_ref[...].astype(jnp.float32), _EPS_CERT)  # (Tr,128)
    mask = mask_ref[...].astype(jnp.float32)                          # (Tr,128)

    # loss_map = 3*log(c) + d / (2*c^2), then masked
    loss_map = 3.0 * jnp.log(cert) + loss_reg / (2.0 * cert * cert)
    masked_loss = loss_map * mask

    # clamp(mask*loss_reg - 0.05, 0).nonzero() count == #{mask*loss_reg > 0.05}
    inaccurate = ((mask * loss_reg - _THRES) > 0.0).astype(jnp.float32)

    tr = mask.shape[0]

    def fold(x):
        # (Tr, 128) -> (8, 128) partial sums; layout-aligned reshape so this
        # is pure VALU vreg adds (no XLU cross-lane reduce in the steady state).
        return jnp.sum(x.reshape(tr // _SUBLANES, _SUBLANES, _LANES), axis=0)

    loss_acc_ref[...] += fold(masked_loss)
    mask_acc_ref[...] += fold(mask)
    cnt_acc_ref[...] += fold(inaccurate)


@functools.partial(jax.jit, static_argnames=("max_tile_rows",))
def euclidean_loss_with_uncertainty2(pred, target, mask, certainty,
                                     *, max_tile_rows=512):
    N, C, H, W = pred.shape
    HW = H * W

    rows = pl.cdiv(HW, _LANES)
    tile_rows = min(max_tile_rows, _round_up(rows, _SUBLANES))
    rows_padded = _round_up(rows, tile_rows)
    padded = rows_padded * _LANES
    num_tiles = rows_padded // tile_rows

    def flat_pad(x, lead_shape):
        # -> (*lead_shape, rows_padded, 128), zero-padded tail.  Padded pixels
        # have mask == 0 so they contribute exactly 0 to every reduction.
        x = x.reshape(*lead_shape, HW)
        if padded != HW:
            pad_cfg = [(0, 0)] * len(lead_shape) + [(0, padded - HW)]
            x = jnp.pad(x, pad_cfg)
        return x.reshape(*lead_shape, rows_padded, _LANES)

    pred_r = flat_pad(pred, (N, C))
    target_r = flat_pad(target, (N, C))
    mask_r = flat_pad(mask, (N,))
    cert_r = flat_pad(certainty.reshape(N, H, W), (N,))

    acc_shape = jax.ShapeDtypeStruct((N, _SUBLANES, _LANES), jnp.float32)
    acc_spec = pl.BlockSpec((pl.Squeezed(), _SUBLANES, _LANES),
                            lambda b, t: (b, 0, 0))

    coord_spec = pl.BlockSpec((pl.Squeezed(), C, tile_rows, _LANES),
                              lambda b, t: (b, 0, t, 0))
    plane_spec = pl.BlockSpec((pl.Squeezed(), tile_rows, _LANES),
                              lambda b, t: (b, t, 0))

    loss_acc, mask_acc, cnt_acc = pl.pallas_call(
        _loss_kernel,
        out_shape=(acc_shape, acc_shape, acc_shape),
        grid_spec=pltpu.PrefetchScalarGridSpec(
            num_scalar_prefetch=0,
            grid=(N, num_tiles),
            in_specs=[coord_spec, coord_spec, plane_spec, plane_spec],
            out_specs=(acc_spec, acc_spec, acc_spec),
        ),
        compiler_params=pltpu.CompilerParams(
            dimension_semantics=("parallel", "arbitrary")),
    )(pred_r, target_r, mask_r, cert_r)

    total_loss = jnp.sum(loss_acc)
    mask_sum = jnp.sum(mask_acc)
    cnt_inaccurate = jnp.sum(cnt_acc)

    loss = total_loss / mask_sum
    valid_pixel = mask_sum + 1.0
    num_accurate = valid_pixel - cnt_inaccurate
    accuracy = num_accurate / valid_pixel
    return loss, accuracy


def _reference(pred, target, mask, certainty):
    # Pure-JAX replica of the PyTorch forward (for correctness checking).
    diff = pred - target + _EPS_PDIST
    loss_reg = jnp.sqrt(jnp.sum(diff * diff, axis=1))          # (N, H, W)
    cert = jnp.maximum(certainty, _EPS_CERT)                   # (N, 1, H, W)
    loss_map = (3.0 * jnp.log(cert)
                + loss_reg[:, None] / (2.0 * cert * cert))[:, 0]
    loss_map = loss_map * mask
    loss = jnp.sum(loss_map) / jnp.sum(mask)
    valid_pixel = jnp.sum(mask) + 1.0
    diff_coord = mask * loss_reg
    thres = jnp.maximum(diff_coord - _THRES, 0.0)
    num_accurate = valid_pixel - jnp.sum(thres != 0.0)
    return loss, num_accurate / valid_pixel


if __name__ == "__main__":
    key = jax.random.PRNGKey(0)
    k1, k2, k3, k4 = jax.random.split(key, 4)

    N, C, H, W = 2, 3, 16, 16
    pred = jax.random.normal(k1, (N, C, H, W), jnp.float32)
    target = jax.random.normal(k2, (N, C, H, W), jnp.float32)
    mask = (jax.random.uniform(k3, (N, H, W)) > 0.3).astype(jnp.float32)
    certainty = jax.random.uniform(k4, (N, 1, H, W), jnp.float32,
                                   minval=0.1, maxval=2.0)

    loss, accuracy = euclidean_loss_with_uncertainty2(pred, target, mask, certainty)
    jax.block_until_ready((loss, accuracy))

    ref_loss, ref_acc = _reference(pred, target, mask, certainty)
    assert jnp.allclose(loss, ref_loss, rtol=1e-5, atol=1e-5), (loss, ref_loss)
    assert jnp.allclose(accuracy, ref_acc, rtol=1e-5, atol=1e-5), (accuracy, ref_acc)

    print("KERNEL_OK")
</pallas_src>

<mosaic_0001>
module attributes {stable_mosaic.version = 11 : i64} {
  func.func @_loss_kernel(%arg0: i32, %arg1: i32, %arg2: memref<1x3x8x128xf32, #tpu.memory_space<vmem>>, %arg3: memref<1x3x8x128xf32, #tpu.memory_space<vmem>>, %arg4: memref<1x8x128xf32, #tpu.memory_space<vmem>>, %arg5: memref<1x8x128xf32, #tpu.memory_space<vmem>>, %arg6: memref<1x8x128xf32, #tpu.memory_space<vmem>>, %arg7: memref<1x8x128xf32, #tpu.memory_space<vmem>>, %arg8: memref<1x8x128xf32, #tpu.memory_space<vmem>>) attributes {dimension_semantics = [#tpu.dimension_semantics<parallel>, #tpu.dimension_semantics<arbitrary>], iteration_bounds = array<i64: 2, 1>, scalar_prefetch = 0 : i64, scratch_operands = 0 : i64, tpu.core_type = #tpu.core_type<tc>, window_params = [{transform_indices = @transform_0, window_bounds = array<i64: 1, 3, 8, 128>}, {transform_indices = @transform_1, window_bounds = array<i64: 1, 3, 8, 128>}, {transform_indices = @transform_2, window_bounds = array<i64: 1, 8, 128>}, {transform_indices = @transform_3, window_bounds = array<i64: 1, 8, 128>}, {transform_indices = @transform_4, window_bounds = array<i64: 1, 8, 128>}, {transform_indices = @transform_5, window_bounds = array<i64: 1, 8, 128>}, {transform_indices = @transform_6, window_bounds = array<i64: 1, 8, 128>}]} {
    %c0_i32 = arith.constant 0 : i32
    %0 = arith.cmpi eq, %arg1, %c0_i32 : i32
    %1 = arith.extui %0 : i1 to i32
    %c0_i32_0 = arith.constant 0 : i32
    %2 = arith.cmpi ne, %1, %c0_i32_0 : i32
    scf.if %2 {
      %cst_41 = arith.constant 0.000000e+00 : f32
      %59 = vector.broadcast %cst_41 : f32 to vector<8x128xf32>
      %c0_42 = arith.constant 0 : index
      %c0_43 = arith.constant 0 : index
      %c0_44 = arith.constant 0 : index
      %60 = vector.load %arg6[%c0_42, %c0_43, %c0_44] : memref<1x8x128xf32, #tpu.memory_space<vmem>>, vector<1x8x128xf32>
      %61 = vector.shape_cast %60 : vector<1x8x128xf32> to vector<8x128xf32>
      %62 = vector.shape_cast %59 : vector<8x128xf32> to vector<1x8x128xf32>
      tpu.vector_store %arg6[%c0_42, %c0_43, %c0_44], %62 {strides = array<i32>} : memref<1x8x128xf32, #tpu.memory_space<vmem>>, vector<1x8x128xf32>,
      %cst_45 = arith.constant 0.000000e+00 : f32
      %63 = vector.broadcast %cst_45 : f32 to vector<8x128xf32>
      %c0_46 = arith.constant 0 : index
      %c0_47 = arith.constant 0 : index
      %c0_48 = arith.constant 0 : index
      %64 = vector.load %arg7[%c0_46, %c0_47, %c0_48] : memref<1x8x128xf32, #tpu.memory_space<vmem>>, vector<1x8x128xf32>
      %65 = vector.shape_cast %64 : vector<1x8x128xf32> to vector<8x128xf32>
      %66 = vector.shape_cast %63 : vector<8x128xf32> to vector<1x8x128xf32>
      tpu.vector_store %arg7[%c0_46, %c0_47, %c0_48], %66 {strides = array<i32>} : memref<1x8x128xf32, #tpu.memory_space<vmem>>, vector<1x8x128xf32>,
      %cst_49 = arith.constant 0.000000e+00 : f32
      %67 = vector.broadcast %cst_49 : f32 to vector<8x128xf32>
      %c0_50 = arith.constant 0 : index
      %c0_51 = arith.constant 0 : index
      %c0_52 = arith.constant 0 : index
      %68 = vector.load %arg8[%c0_50, %c0_51, %c0_52] : memref<1x8x128xf32, #tpu.memory_space<vmem>>, vector<1x8x128xf32>
      %69 = vector.shape_cast %68 : vector<1x8x128xf32> to vector<8x128xf32>
      %70 = vector.shape_cast %67 : vector<8x128xf32> to vector<1x8x128xf32>
      tpu.vector_store %arg8[%c0_50, %c0_51, %c0_52], %70 {strides = array<i32>} : memref<1x8x128xf32, #tpu.memory_space<vmem>>, vector<1x8x128xf32>,
    } else {
    }
    %c0 = arith.constant 0 : index
    %c0_1 = arith.constant 0 : index
    %c0_2 = arith.constant 0 : index
    %c0_3 = arith.constant 0 : index
    %3 = vector.load %arg2[%c0, %c0_1, %c0_2, %c0_3] : memref<1x3x8x128xf32, #tpu.memory_space<vmem>>, vector<1x3x8x128xf32>
    %4 = vector.shape_cast %3 : vector<1x3x8x128xf32> to vector<3x8x128xf32>
    %c0_4 = arith.constant 0 : index
    %c0_5 = arith.constant 0 : index
    %c0_6 = arith.constant 0 : index
    %c0_7 = arith.constant 0 : index
    %5 = vector.load %arg3[%c0_4, %c0_5, %c0_6, %c0_7] : memref<1x3x8x128xf32, #tpu.memory_space<vmem>>, vector<1x3x8x128xf32>
    %6 = vector.shape_cast %5 : vector<1x3x8x128xf32> to vector<3x8x128xf32>
    %7 = arith.subf %4, %6 : vector<3x8x128xf32>
    %cst = arith.constant 9.99999997E-7 : f32
    %8 = vector.broadcast %cst : f32 to vector<3x8x128xf32>
    %9 = arith.addf %7, %8 : vector<3x8x128xf32>
    %10 = arith.mulf %9, %9 : vector<3x8x128xf32>
    %cst_8 = arith.constant dense<0.000000e+00> : vector<8x128xf32>
    %11 = vector.multi_reduction <add>, %10, %cst_8 [0] : vector<3x8x128xf32> to vector<8x128xf32>
    %12 = math.sqrt %11 : vector<8x128xf32>
    %c0_9 = arith.constant 0 : index
    %c0_10 = arith.constant 0 : index
    %c0_11 = arith.constant 0 : index
    %13 = vector.load %arg5[%c0_9, %c0_10, %c0_11] : memref<1x8x128xf32, #tpu.memory_space<vmem>>, vector<1x8x128xf32>
    %14 = vector.shape_cast %13 : vector<1x8x128xf32> to vector<8x128xf32>
    %cst_12 = arith.constant 9.99999997E-7 : f32
    %15 = vector.broadcast %cst_12 : f32 to vector<8x128xf32>
    %16 = arith.maximumf %14, %15 : vector<8x128xf32>
    %c0_13 = arith.constant 0 : index
    %c0_14 = arith.constant 0 : index
    %c0_15 = arith.constant 0 : index
    %17 = vector.load %arg4[%c0_13, %c0_14, %c0_15] : memref<1x8x128xf32, #tpu.memory_space<vmem>>, vector<1x8x128xf32>
    %18 = vector.shape_cast %17 : vector<1x8x128xf32> to vector<8x128xf32>
    %19 = math.log %16 : vector<8x128xf32>
    %cst_16 = arith.constant 3.000000e+00 : f32
    %20 = vector.broadcast %cst_16 : f32 to vector<8x128xf32>
    %21 = arith.mulf %20, %19 : vector<8x128xf32>
    %cst_17 = arith.constant 2.000000e+00 : f32
    %22 = vector.broadcast %cst_17 : f32 to vector<8x128xf32>
    %23 = arith.mulf %22, %16 : vector<8x128xf32>
    %24 = arith.mulf %23, %16 : vector<8x128xf32>
    %25 = arith.divf %12, %24 : vector<8x128xf32>
    %26 = arith.addf %21, %25 : vector<8x128xf32>
    %27 = arith.mulf %26, %18 : vector<8x128xf32>
    %28 = arith.mulf %18, %12 : vector<8x128xf32>
    %cst_18 = arith.constant 5.000000e-02 : f32
    %29 = vector.broadcast %cst_18 : f32 to vector<8x128xf32>
    %30 = arith.subf %28, %29 : vector<8x128xf32>
    %cst_19 = arith.constant 0.000000e+00 : f32
    %31 = vector.broadcast %cst_19 : f32 to vector<8x128xf32>
    %32 = arith.cmpf ogt, %30, %31 : vector<8x128xf32>
    %33 = arith.extui %32 : vector<8x128xi1> to vector<8x128xi32>
    %34 = arith.sitofp %33 : vector<8x128xi32> to vector<8x128xf32>
    %c0_20 = arith.constant 0 : index
    %c0_21 = arith.constant 0 : index
    %c0_22 = arith.constant 0 : index
    %35 = vector.load %arg6[%c0_20, %c0_21, %c0_22] : memref<1x8x128xf32, #tpu.memory_space<vmem>>, vector<1x8x128xf32>
    %36 = vector.shape_cast %35 : vector<1x8x128xf32> to vector<8x128xf32>
    %37 = vector.shape_cast %27 : vector<8x128xf32> to vector<1x8x128xf32>
    %cst_23 = arith.constant dense<0.000000e+00> : vector<8x128xf32>
    %38 = vector.multi_reduction <add>, %37, %cst_23 [0] : vector<1x8x128xf32> to vector<8x128xf32>
    %39 = arith.addf %36, %38 : vector<8x128xf32>
    %c0_24 = arith.constant 0 : index
    %c0_25 = arith.constant 0 : index
    %c0_26 = arith.constant 0 : index
    %40 = vector.load %arg6[%c0_24, %c0_25, %c0_26] : memref<1x8x128xf32, #tpu.memory_space<vmem>>, vector<1x8x128xf32>
    %41 = vector.shape_cast %40 : vector<1x8x128xf32> to vector<8x128xf32>
    %42 = vector.shape_cast %39 : vector<8x128xf32> to vector<1x8x128xf32>
    tpu.vector_store %arg6[%c0_24, %c0_25, %c0_26], %42 {strides = array<i32>} : memref<1x8x128xf32, #tpu.memory_space<vmem>>, vector<1x8x128xf32>,
    %c0_27 = arith.constant 0 : index
    %c0_28 = arith.constant 0 : index
    %c0_29 = arith.constant 0 : index
    %43 = vector.load %arg7[%c0_27, %c0_28, %c0_29] : memref<1x8x128xf32, #tpu.memory_space<vmem>>, vector<1x8x128xf32>
    %44 = vector.shape_cast %43 : vector<1x8x128xf32> to vector<8x128xf32>
    %45 = vector.shape_cast %18 : vector<8x128xf32> to vector<1x8x128xf32>
    %cst_30 = arith.constant dense<0.000000e+00> : vector<8x128xf32>
    %46 = vector.multi_reduction <add>, %45, %cst_30 [0] : vector<1x8x128xf32> to vector<8x128xf32>
    %47 = arith.addf %44, %46 : vector<8x128xf32>
    %c0_31 = arith.constant 0 : index
    %c0_32 = arith.constant 0 : index
    %c0_33 = arith.constant 0 : index
    %48 = vector.load %arg7[%c0_31, %c0_32, %c0_33] : memref<1x8x128xf32, #tpu.memory_space<vmem>>, vector<1x8x128xf32>
    %49 = vector.shape_cast %48 : vector<1x8x128xf32> to vector<8x128xf32>
    %50 = vector.shape_cast %47 : vector<8x128xf32> to vector<1x8x128xf32>
    tpu.vector_store %arg7[%c0_31, %c0_32, %c0_33], %50 {strides = array<i32>} : memref<1x8x128xf32, #tpu.memory_space<vmem>>, vector<1x8x128xf32>,
    %c0_34 = arith.constant 0 : index
    %c0_35 = arith.constant 0 : index
    %c0_36 = arith.constant 0 : index
    %51 = vector.load %arg8[%c0_34, %c0_35, %c0_36] : memref<1x8x128xf32, #tpu.memory_space<vmem>>, vector<1x8x128xf32>
    %52 = vector.shape_cast %51 : vector<1x8x128xf32> to vector<8x128xf32>
    %53 = vector.shape_cast %34 : vector<8x128xf32> to vector<1x8x128xf32>
    %cst_37 = arith.constant dense<0.000000e+00> : vector<8x128xf32>
    %54 = vector.multi_reduction <add>, %53, %cst_37 [0] : vector<1x8x128xf32> to vector<8x128xf32>
    %55 = arith.addf %52, %54 : vector<8x128xf32>
    %c0_38 = arith.constant 0 : index
    %c0_39 = arith.constant 0 : index
    %c0_40 = arith.constant 0 : index
    %56 = vector.load %arg8[%c0_38, %c0_39, %c0_40] : memref<1x8x128xf32, #tpu.memory_space<vmem>>, vector<1x8x128xf32>
    %57 = vector.shape_cast %56 : vector<1x8x128xf32> to vector<8x128xf32>
    %58 = vector.shape_cast %55 : vector<8x128xf32> to vector<1x8x128xf32>
    tpu.vector_store %arg8[%c0_38, %c0_39, %c0_40], %58 {strides = array<i32>} : memref<1x8x128xf32, #tpu.memory_space<vmem>>, vector<1x8x128xf32>,
    return
  }
  func.func @transform_0(%arg0: i32, %arg1: i32) -> (i32, i32, i32, i32) {
    %c0_i32 = arith.constant 0 : i32
    %c0_i32_0 = arith.constant 0 : i32
    %c0_i32_1 = arith.constant 0 : i32
    return %arg0, %c0_i32, %arg1, %c0_i32_0 : i32, i32, i32, i32
  }
  func.func @transform_1(%arg0: i32, %arg1: i32) -> (i32, i32, i32, i32) {
    %c0_i32 = arith.constant 0 : i32
    %c0_i32_0 = arith.constant 0 : i32
    %c0_i32_1 = arith.constant 0 : i32
    return %arg0, %c0_i32, %arg1, %c0_i32_0 : i32, i32, i32, i32
  }
  func.func @transform_2(%arg0: i32, %arg1: i32) -> (i32, i32, i32) {
    %c0_i32 = arith.constant 0 : i32
    %c0_i32_0 = arith.constant 0 : i32
    return %arg0, %arg1, %c0_i32 : i32, i32, i32
  }
  func.func @transform_3(%arg0: i32, %arg1: i32) -> (i32, i32, i32) {
    %c0_i32 = arith.constant 0 : i32
    %c0_i32_0 = arith.constant 0 : i32
    return %arg0, %arg1, %c0_i32 : i32, i32, i32
  }
  func.func @transform_4(%arg0: i32, %arg1: i32) -> (i32, i32, i32) {
    %c0_i32 = arith.constant 0 : i32
    %c0_i32_0 = arith.constant 0 : i32
    %c0_i32_1 = arith.constant 0 : i32
    return %arg0, %c0_i32, %c0_i32_0 : i32, i32, i32
  }
  func.func @transform_5(%arg0: i32, %arg1: i32) -> (i32, i32, i32) {
    %c0_i32 = arith.constant 0 : i32
    %c0_i32_0 = arith.constant 0 : i32
    %c0_i32_1 = arith.constant 0 : i32
    return %arg0, %c0_i32, %c0_i32_0 : i32, i32, i32
  }
  func.func @transform_6(%arg0: i32, %arg1: i32) -> (i32, i32, i32) {
    %c0_i32 = arith.constant 0 : i32
    %c0_i32_0 = arith.constant 0 : i32
    %c0_i32_1 = arith.constant 0 : i32
    return %arg0, %c0_i32, %c0_i32_0 : i32, i32, i32
  }
}

</mosaic_0001>

<bundles_post_ra>
// kernel: euclidean_loss_with_uncertainty2.1
= control target key start
LH: loop header
LB: loop body
LE: loop exit
PB: predicated region body
PF: predicated region fallthrough
CT: control target
= control target key end

     0   :  { %s726_s21 = smov 0   ;;  %s728_s22 = smov 0   ;;  %s781_s0 = inlined_call_operand.vmem [shape: f32[2,3,8,128], index: 0, kind: input, shape index: {}]   ;;  %s782_s1 = inlined_call_operand.vmem [shape: f32[2,3,8,128], index: 1, kind: input, shape index: {}]   ;;  %s783_s2 = inlined_call_operand.vmem [shape: f32[2,8,128], index: 2, kind: input, shape index: {}]   ;;  %s784_s3 = inlined_call_operand.vmem [shape: f32[2,8,128], index: 3, kind: input, shape index: {}]   ;;  %s785_s4 = inlined_call_operand.vmem [shape: f32[2,8,128], index: 4, kind: output, shape index: {0}]   ;;  %s786_s5 = inlined_call_operand.vmem [shape: f32[2,8,128], index: 5, kind: output, shape index: {1}]   ;;  %s787_s6 = inlined_call_operand.vmem [shape: f32[2,8,128], index: 6, kind: output, shape index: {2}]  }
   0x1   :  { %s730_s23 = smov 0  }
   0x2 LB: > { %s29_s24 = sadd.s32 1, %s684_s22  ;;  %p622_p0 = scmp.ge.s32.totalorder %s688_s23, 1  ;;  %s688_s23 = sphi %s730_s23, %s17_s23   ;;  %s684_s22 = sphi %s728_s22, %s789_s22   ;;  %s680_s21 = sphi %s726_s21, %s788_s21  }
   0x3   : > { %p31_p1 = scmp.ge.s32.totalorder %s29_s24, 2  ;;  %p277_p2 = scmp.lt.s32.totalorder %s688_s23, 3 }
   0x5   : > { %s791_s24 = smov (%p31_p1, %s29_s24), 0  ;;  %p278_p3 = pnand %p622_p0, %p277_p2 }
   0x6   : > { %p339_p4 = scmp.lt.s32.totalorder (!%p278_p3), %s680_s21, 1  ;;  %v690_v36 = vmov (!%p278_p3), 0.0  }
   0x7   : > { %281 = sbr.rel (%p278_p3) target bundleno = 52 (0x34), region = 36 }
   0xe   : > { %s793_s21 = smov (!%p339_p4, %s680_s21), 1 }
   0xf   : > { %s634_s25 = smul.u32 24, %s793_s21  ;;  %s744_s26 = sshll.u32 %s793_s21, 3 }
  0x10   : > { %s368_s29 = scalar_lea.vmem %s784_s3, %s744_s26  ;;  %s361_s14 = scalar_lea.vmem %s783_s2, %s744_s26 }
  0x11   : > { %s346_s8 = scalar_lea.vmem %s781_s0, %s634_s25  ;;  %s354_s11 = scalar_lea.vmem %s782_s1, %s634_s25  ;;  %v412_v0 = vld [vmem:[%s368_s29] sm:$0xff] }
  0x12   : > { %v388_v1 = vld [vmem:[%s346_s8] sm:$0xff]  ;;  %v389_v2 = vld [vmem:[%s346_s8 + $0x8] sm:$0xff]  ;;  %v390_v3 = vld [vmem:[%s346_s8 + $0x10] sm:$0xff]  ;;  %v413_v10 = vmax.f32 %v412_v0, 1e-06  ;;  %s376_s17 = scalar_lea.vmem %s786_s5, %s744_s26  ;;  %s372_s20 = scalar_lea.vmem %s785_s4, %s744_s26 }
  0x13   : > { %v391_v4 = vld [vmem:[%s354_s11] sm:$0xff]  ;;  %v392_v5 = vld [vmem:[%s354_s11 + $0x8] sm:$0xff]  ;;  %v393_v6 = vld [vmem:[%s354_s11 + $0x10] sm:$0xff]  ;;  %s380_s27 = scalar_lea.vmem %s787_s6, %s744_s26 }
  0x14   : > { %v394_v7 = vsub.f32 %v388_v1, %v391_v4  ;;  %v395_v8 = vsub.f32 %v389_v2, %v392_v5  ;;  %v396_v9 = vsub.f32 %v390_v3, %v393_v6  ;;  %v414_v11 = vld [vmem:[%s361_s14] sm:$0xff]  ;;  %v418_v18 = vmul.f32 2.0, %v413_v10 }
  0x15   : > { %436 = vst [vmem:[%s376_s17] sm:$0xff] %v414_v11  ;;  %660 = vlog2.f32 %v413_v10 }
  0x16   : > { %v397_v12 = vadd.f32 1e-06, %v394_v7  ;;  %v398_v13 = vadd.f32 1e-06, %v395_v8  ;;  %v399_v14 = vadd.f32 1e-06, %v396_v9  ;;  %v419_v21 = vmul.f32 %v418_v18, %v413_v10 }
  0x18   : > { %v400_v15 = vmul.f32 %v397_v12, %v397_v12  ;;  %v401_v16 = vmul.f32 %v398_v13, %v398_v13  ;;  %v402_v17 = vmul.f32 %v399_v14, %v399_v14 }
  0x1a   : > { %v403_v19 = vadd.f32 %v401_v16, %v400_v15 }
  0x1c   : > { %v404_v20 = vadd.f32 %v403_v19, %v402_v17 }
  0x1e   : > { %662 = vrsqrt.f32 %v404_v20  ;;  %vm407_vm0 = vcmp.eq.f32.partialorder %v404_v20, inf  ;;  %v410_v25 = vand.u32 2147483648, %v404_v20  ;;  %vm409_vm1 = vcmp.eq.f32.partialorder %v404_v20, 0.0 }
  0x1f   : > { %664 = vrcp.f32 %v419_v21  ;;  %v661_v22 = vpop.eup %660 }
  0x20   : > { %v416_v23 = vmul.f32 0.6931472, %v661_v22 }
  0x22   : > { %v417_v29 = vmul.f32 3.0, %v416_v23 }
  0x28   : > { %v663_v24 = vpop.eup %662 }
  0x29   : > { %v406_v26 = vmul.f32 %v663_v24, %v404_v20  ;;  %v665_v27 = vpop.eup %664 }
  0x2b   : > { %v408_v28 = vsel %vm407_vm0, %v404_v20, %v406_v26 }
  0x2c   : > { %v411_v30 = vsel %vm409_vm1, %v410_v25, %v408_v28 }
  0x2d   : > { %v421_v31 = vmul.f32 %v665_v27, %v411_v30  ;;  %v424_v32 = vmul.f32 %v414_v11, %v411_v30 }
  0x2f   : > { %v422_v33 = vadd.f32 %v421_v31, %v417_v29  ;;  %v630_v34 = vadd.f32 -0.05, %v424_v32 }
  0x31   : > { %v423_v35 = vmul.f32 %v422_v33, %v414_v11  ;;  %vm426_vm2 = vcmp.gt.f32.partialorder %v630_v34, 0.0 }
  0x32   : > { %v631_v37 = vsel %vm426_vm2, 1.0, %v690_v36 }
  0x33   : > { %432 = vst [vmem:[%s372_s20] sm:$0xff] %v423_v35  ;;  %440 = vst [vmem:[%s380_s27] sm:$0xff] %v631_v37 }
  0x34 PF: > { %s17_s23 = sadd.s32 1, %s688_s23   ;;  %s788_s21 = smov %s684_s22 }
  0x35   : > { %p14_p5 = scmp.ge.s32.totalorder %s17_s23, 4   ;;  %s789_s22 = smov %s791_s24 }
  0x37   :  { %16 = sbr.rel (!%p14_p5) target bundleno = 2 (0x2), region = 103 }

</bundles_post_ra>
